<compile_context>
chip_gen: v5e
topology: v5e:2x2
jax: 0.10.0
libtpu: 0.0.40
codegen_flags: <defaults>
</compile_context>

<pallas_src>
import functools

import jax
import jax.numpy as jnp
import numpy as np
from jax.experimental import pallas as pl
from jax.experimental.pallas import tpu as pltpu


CONFIG = {
    "conv_transpose_params": dict(
        in_channels=4,
        out_channels=8,
        kernel_size=3,
        stride=2,
        padding=1,
        output_padding=1,
    )
}
BN_EPS = 1e-5


# ----------------------------- Pallas kernel ------------------------------

def _fused_convt_bn_relu_kernel(lhs_ref, r_ref, gamma_ref, beta_ref, o_ref, *,
                                OW, COUT, inv_count, eps):
    """Fused: transposed conv (one band-fused matmul) + training-mode BN + ReLU."""
    cols = OW * COUT

    # --- transposed conv: single MXU matmul against the banded / Toeplitz weight ---
    acc = jnp.dot(lhs_ref[...], r_ref[...], preferred_element_type=jnp.float32)

    # --- BN statistics (PyTorch training mode: mean / biased var over N,H,W) ---
    # Reduce over rows first (linearity), then group-sum over the OW positions of each
    # channel with a roll tree (XLU slot, no selector matmul, no 256x256 constant).
    row_sum = jnp.sum(acc, axis=0, keepdims=True)           # (1, OW*COUT)
    row_sq = jnp.sum(acc * acc, axis=0, keepdims=True)      # (1, OW*COUT)
    stats = jnp.concatenate([row_sum, row_sq], axis=0)      # (2, OW*COUT)

    if OW & (OW - 1) == 0:                                  # power-of-two OW: log2(OW) rolls
        shift = COUT
        while shift < cols:
            stats = stats + pltpu.roll(stats, shift=shift, axis=1)
            shift *= 2
    else:                                                   # generic fallback: OW-1 rolls
        total = stats
        for m in range(1, OW):
            total = total + pltpu.roll(stats, shift=m * COUT, axis=1)
        stats = total
    # stats[r, ow*COUT + co] now holds the per-channel total, broadcast to every ow lane.

    mean = stats[0:1, :] * inv_count
    ex2 = stats[1:2, :] * inv_count
    var = jnp.maximum(ex2 - mean * mean, 0.0)               # biased var, clamped >= 0
    scale = gamma_ref[...] * jax.lax.rsqrt(var + eps)       # (1, cols)
    offset = beta_ref[...] - mean * scale

    # --- BN affine + ReLU + lane-dense store ---
    o_ref[...] = jnp.maximum(acc * scale + offset, 0.0).astype(o_ref.dtype)


# ------------------------------ JAX wrapper -------------------------------

def make_conv_transpose_block(weight, gamma, beta, params, input_hw):
    """Caches all weight-side preprocessing once and returns a jitted forward.

    weight: (CIN, COUT, K, K) PyTorch ConvTranspose2d layout (bias=False).
    """
    H, W = input_hw
    CIN, COUT, K, _ = weight.shape
    assert COUT == params["out_channels"] and K == params["kernel_size"]
    s, p, op = params["stride"], params["padding"], params["output_padding"]
    OH = (H - 1) * s - 2 * p + K + op
    OW = (W - 1) * s - 2 * p + K + op
    pb, pa = K - 1 - p, K - 1 - p + op
    Hp, Wp = OH + K - 1, OW + K - 1
    WPC = Wp * CIN
    cols = OW * COUT

    # ---- cached weight-side preprocessing (runs once per weight set) ----
    # wflip[kh, kw, c, co] = weight[c, co, K-1-kh, K-1-kw]; expanded into the banded
    # R[(kh, wp, c), (ow, co)] = wflip[kh, wp-ow, c, co] for 0 <= wp-ow < K, else 0.
    wflip = jnp.transpose(weight[:, :, ::-1, ::-1], (2, 3, 0, 1)).astype(jnp.float32)
    kwm = jnp.arange(Wp)[:, None] - jnp.arange(OW)[None, :]          # (Wp, OW)
    valid = ((kwm >= 0) & (kwm < K)).astype(jnp.float32)
    taps = jnp.take(wflip, jnp.clip(kwm, 0, K - 1), axis=1)          # (K, Wp, OW, CIN, COUT)
    taps = taps * valid[None, :, :, None, None]
    R = jnp.transpose(taps, (0, 1, 3, 2, 4)).reshape(K * WPC, cols)  # (K*Wp*CIN, OW*COUT)

    gamma_b = jnp.tile(gamma.astype(jnp.float32), OW).reshape(1, cols)
    beta_b = jnp.tile(beta.astype(jnp.float32), OW).reshape(1, cols)

    @jax.jit
    def apply(x_nchw):
        N, cin, h, w = x_nchw.shape
        assert (cin, h, w) == (CIN, H, W)
        rows = N * OH

        # glue: NCHW -> NHWC; zero-insert (stride) + edge pad in ONE lax.pad (interior
        # padding); band-stack the K sliding row-windows so the kernel does a single
        # depth-(K*Wp*CIN) matmul with a lane-dense (N*OH, OW*COUT) output.
        x = jnp.transpose(x_nchw, (0, 2, 3, 1)).astype(jnp.float32)
        xpad = jax.lax.pad(x, jnp.float32(0.0),
                           ((0, 0, 0), (pb, pa, s - 1), (pb, pa, s - 1), (0, 0, 0)))
        x3 = xpad.reshape(N, Hp, WPC)                                  # (N, Hp, Wp*CIN)
        lhs = jnp.stack([x3[:, kh:kh + OH, :] for kh in range(K)], axis=2)
        lhs = lhs.reshape(rows, K * WPC)                               # (N*OH, K*Wp*CIN)

        kernel = functools.partial(
            _fused_convt_bn_relu_kernel,
            OW=OW, COUT=COUT, inv_count=1.0 / float(N * OH * OW), eps=BN_EPS)

        cost = pl.CostEstimate(
            flops=2 * rows * (K * WPC) * cols + 8 * rows * cols,
            transcendentals=cols,
            bytes_accessed=4 * (rows * K * WPC + K * WPC * cols + 2 * cols + rows * cols))

        out2d = pl.pallas_call(
            kernel,
            out_shape=jax.ShapeDtypeStruct((rows, cols), jnp.float32),
            grid=(1,),
            in_specs=[
                pl.BlockSpec((rows, K * WPC), lambda i: (0, 0)),
                pl.BlockSpec((K * WPC, cols), lambda i: (0, 0)),
                pl.BlockSpec((1, cols), lambda i: (0, 0)),
                pl.BlockSpec((1, cols), lambda i: (0, 0)),
            ],
            out_specs=pl.BlockSpec((rows, cols), lambda i: (0, 0)),
            compiler_params=pltpu.CompilerParams(
                dimension_semantics=("arbitrary",)),
            cost_estimate=cost,
        )(lhs, R, gamma_b, beta_b)

        out_nhwc = out2d.reshape(N, OH, OW, COUT)        # free (row-major identical)
        return jnp.transpose(out_nhwc, (0, 3, 1, 2))     # back to NCHW (module contract)

    return apply


# ------------------------------ pure-JAX ref -------------------------------

def reference(x_nchw, weight, gamma, beta, params):
    K = params["kernel_size"]
    s = params["stride"]
    p = params["padding"]
    op = params["output_padding"]
    w_t = jnp.transpose(weight[:, :, ::-1, ::-1], (1, 0, 2, 3))          # (COUT, CIN, K, K)
    y = jax.lax.conv_general_dilated(
        x_nchw, w_t, window_strides=(1, 1),
        padding=[(K - 1 - p, K - 1 - p + op), (K - 1 - p, K - 1 - p + op)],
        lhs_dilation=(s, s), rhs_dilation=(1, 1),
        dimension_numbers=("NCHW", "OIHW", "NCHW"))
    mean = y.mean(axis=(0, 2, 3), keepdims=True)
    var = y.var(axis=(0, 2, 3), keepdims=True)                           # biased (training BN)
    yn = (y - mean) * jax.lax.rsqrt(var + BN_EPS)
    yn = yn * gamma.reshape(1, -1, 1, 1) + beta.reshape(1, -1, 1, 1)
    return jnp.maximum(yn, 0.0)


if __name__ == "__main__":
    params = CONFIG["conv_transpose_params"]
    N, H, W = 2, 16, 16
    CIN, COUT, K = params["in_channels"], params["out_channels"], params["kernel_size"]

    key = jax.random.PRNGKey(0)
    kx, kw = jax.random.split(key)
    x = jax.random.normal(kx, (N, CIN, H, W), jnp.float32)
    # PyTorch ConvTranspose2d weight shape: (in_channels, out_channels, kH, kW); bias=False.
    bound = 1.0 / np.sqrt(COUT * K * K)
    weight = jax.random.uniform(kw, (CIN, COUT, K, K), jnp.float32, -bound, bound)
    gamma = jnp.ones((COUT,), jnp.float32)   # BatchNorm2d default init
    beta = jnp.zeros((COUT,), jnp.float32)

    block = make_conv_transpose_block(weight, gamma, beta, params, input_hw=(H, W))
    out = block(x)
    out = jax.block_until_ready(out)

    ref = reference(x, weight, gamma, beta, params)
    np.testing.assert_allclose(np.asarray(out), np.asarray(ref), atol=1e-4, rtol=1e-4)
    print("KERNEL_OK")
</pallas_src>

<mosaic_0001>
module attributes {stable_mosaic.version = 11 : i64} {
  func.func @_fused_convt_bn_relu_kernel(%arg0: i32, %arg1: memref<64x408xf32, #tpu.memory_space<vmem>>, %arg2: memref<408x256xf32, #tpu.memory_space<vmem>>, %arg3: memref<1x256xf32, #tpu.memory_space<vmem>>, %arg4: memref<1x256xf32, #tpu.memory_space<vmem>>, %arg5: memref<64x256xf32, #tpu.memory_space<vmem>>) attributes {dimension_semantics = [#tpu.dimension_semantics<arbitrary>], iteration_bounds = array<i64: 1>, scalar_prefetch = 0 : i64, scratch_operands = 0 : i64, tpu.core_type = #tpu.core_type<tc>, window_params = [{pipeline_mode = #tpu.pipeline_mode<synchronous>, transform_indices = @transform_0, window_bounds = array<i64: 64, 408>}, {pipeline_mode = #tpu.pipeline_mode<synchronous>, transform_indices = @transform_1, window_bounds = array<i64: 408, 256>}, {pipeline_mode = #tpu.pipeline_mode<synchronous>, transform_indices = @transform_2, window_bounds = array<i64: 1, 256>}, {pipeline_mode = #tpu.pipeline_mode<synchronous>, transform_indices = @transform_3, window_bounds = array<i64: 1, 256>}, {pipeline_mode = #tpu.pipeline_mode<synchronous>, transform_indices = @transform_4, window_bounds = array<i64: 64, 256>}]} {
    %c0 = arith.constant 0 : index
    %c0_0 = arith.constant 0 : index
    %0 = vector.load %arg1[%c0, %c0_0] : memref<64x408xf32, #tpu.memory_space<vmem>>, vector<64x408xf32>
    %c0_1 = arith.constant 0 : index
    %c0_2 = arith.constant 0 : index
    %1 = vector.load %arg2[%c0_1, %c0_2] : memref<408x256xf32, #tpu.memory_space<vmem>>, vector<408x256xf32>
    %cst = arith.constant dense<0.000000e+00> : vector<64x256xf32>
    %2 = tpu.matmul %0, %1, %cst {dimension_numbers = #tpu.dot_dimension_numbers<[1], [0], [0], [1], [0, 0, 1, 1], [], []>} : vector<64x408xf32>, vector<408x256xf32>, vector<64x256xf32> -> vector<64x256xf32>
    %cst_3 = arith.constant dense<0.000000e+00> : vector<256xf32>
    %3 = vector.multi_reduction <add>, %2, %cst_3 [0] : vector<64x256xf32> to vector<256xf32>
    %4 = vector.shape_cast %3 : vector<256xf32> to vector<1x256xf32>
    %5 = arith.mulf %2, %2 : vector<64x256xf32>
    %cst_4 = arith.constant dense<0.000000e+00> : vector<256xf32>
    %6 = vector.multi_reduction <add>, %5, %cst_4 [0] : vector<64x256xf32> to vector<256xf32>
    %7 = vector.shape_cast %6 : vector<256xf32> to vector<1x256xf32>
    %8 = tpu.concatenate %4, %7 in 0 : vector<1x256xf32>, vector<1x256xf32> -> vector<2x256xf32>
    %c8_i32 = arith.constant 8 : i32
    %9 = tpu.dynamic_rotate %8 by %c8_i32 dim 1 : vector<2x256xf32>, i32 -> vector<2x256xf32>
    %10 = arith.addf %8, %9 : vector<2x256xf32>
    %c16_i32 = arith.constant 16 : i32
    %11 = tpu.dynamic_rotate %10 by %c16_i32 dim 1 : vector<2x256xf32>, i32 -> vector<2x256xf32>
    %12 = arith.addf %10, %11 : vector<2x256xf32>
    %c32_i32 = arith.constant 32 : i32
    %13 = tpu.dynamic_rotate %12 by %c32_i32 dim 1 : vector<2x256xf32>, i32 -> vector<2x256xf32>
    %14 = arith.addf %12, %13 : vector<2x256xf32>
    %c64_i32 = arith.constant 64 : i32
    %15 = tpu.dynamic_rotate %14 by %c64_i32 dim 1 : vector<2x256xf32>, i32 -> vector<2x256xf32>
    %16 = arith.addf %14, %15 : vector<2x256xf32>
    %c128_i32 = arith.constant 128 : i32
    %17 = tpu.dynamic_rotate %16 by %c128_i32 dim 1 : vector<2x256xf32>, i32 -> vector<2x256xf32>
    %18 = arith.addf %16, %17 : vector<2x256xf32>
    %19 = vector.extract_strided_slice %18 {offsets = [0, 0], sizes = [1, 256], strides = [1, 1]} : vector<2x256xf32> to vector<1x256xf32>
    %cst_5 = arith.constant 4.8828125E-4 : f32
    %20 = vector.broadcast %cst_5 : f32 to vector<1x256xf32>
    %21 = arith.mulf %19, %20 : vector<1x256xf32>
    %22 = vector.extract_strided_slice %18 {offsets = [1, 0], sizes = [1, 256], strides = [1, 1]} : vector<2x256xf32> to vector<1x256xf32>
    %cst_6 = arith.constant 4.8828125E-4 : f32
    %23 = vector.broadcast %cst_6 : f32 to vector<1x256xf32>
    %24 = arith.mulf %22, %23 : vector<1x256xf32>
    %25 = arith.mulf %21, %21 : vector<1x256xf32>
    %26 = arith.subf %24, %25 : vector<1x256xf32>
    %cst_7 = arith.constant 0.000000e+00 : f32
    %27 = vector.broadcast %cst_7 : f32 to vector<1x256xf32>
    %28 = arith.maximumf %26, %27 : vector<1x256xf32>
    %c0_8 = arith.constant 0 : index
    %c0_9 = arith.constant 0 : index
    %29 = vector.load %arg3[%c0_8, %c0_9] : memref<1x256xf32, #tpu.memory_space<vmem>>, vector<1x256xf32>
    %cst_10 = arith.constant 9.99999974E-6 : f32
    %30 = vector.broadcast %cst_10 : f32 to vector<1x256xf32>
    %31 = arith.addf %28, %30 : vector<1x256xf32>
    %32 = math.rsqrt %31 : vector<1x256xf32>
    %33 = arith.mulf %29, %32 : vector<1x256xf32>
    %c0_11 = arith.constant 0 : index
    %c0_12 = arith.constant 0 : index
    %34 = vector.load %arg4[%c0_11, %c0_12] : memref<1x256xf32, #tpu.memory_space<vmem>>, vector<1x256xf32>
    %35 = arith.mulf %21, %33 : vector<1x256xf32>
    %36 = arith.subf %34, %35 : vector<1x256xf32>
    %37 = vector.broadcast %33 : vector<1x256xf32> to vector<64x256xf32>
    %38 = arith.mulf %2, %37 : vector<64x256xf32>
    %39 = vector.broadcast %36 : vector<1x256xf32> to vector<64x256xf32>
    %40 = arith.addf %38, %39 : vector<64x256xf32>
    %cst_13 = arith.constant 0.000000e+00 : f32
    %41 = vector.broadcast %cst_13 : f32 to vector<64x256xf32>
    %42 = arith.maximumf %40, %41 : vector<64x256xf32>
    %c0_14 = arith.constant 0 : index
    %c0_15 = arith.constant 0 : index
    %43 = vector.load %arg5[%c0_14, %c0_15] : memref<64x256xf32, #tpu.memory_space<vmem>>, vector<64x256xf32>
    tpu.vector_store %arg5[%c0_14, %c0_15], %42 {strides = array<i32>} : memref<64x256xf32, #tpu.memory_space<vmem>>, vector<64x256xf32>,
    return
  }
  func.func @transform_0(%arg0: i32) -> (i32, i32) {
    %c0_i32 = arith.constant 0 : i32
    %c0_i32_0 = arith.constant 0 : i32
    %c0_i32_1 = arith.constant 0 : i32
    return %c0_i32, %c0_i32_0 : i32, i32
  }
  func.func @transform_1(%arg0: i32) -> (i32, i32) {
    %c0_i32 = arith.constant 0 : i32
    %c0_i32_0 = arith.constant 0 : i32
    %c0_i32_1 = arith.constant 0 : i32
    return %c0_i32, %c0_i32_0 : i32, i32
  }
  func.func @transform_2(%arg0: i32) -> (i32, i32) {
    %c0_i32 = arith.constant 0 : i32
    %c0_i32_0 = arith.constant 0 : i32
    %c0_i32_1 = arith.constant 0 : i32
    return %c0_i32, %c0_i32_0 : i32, i32
  }
  func.func @transform_3(%arg0: i32) -> (i32, i32) {
    %c0_i32 = arith.constant 0 : i32
    %c0_i32_0 = arith.constant 0 : i32
    %c0_i32_1 = arith.constant 0 : i32
    return %c0_i32, %c0_i32_0 : i32, i32
  }
  func.func @transform_4(%arg0: i32) -> (i32, i32) {
    %c0_i32 = arith.constant 0 : i32
    %c0_i32_0 = arith.constant 0 : i32
    %c0_i32_1 = arith.constant 0 : i32
    return %c0_i32, %c0_i32_0 : i32, i32
  }
}

</mosaic_0001>

<bundles_post_ra>
// kernel: apply.1
= control target key start
LH: loop header
LB: loop body
LE: loop exit
PB: predicated region body
PF: predicated region fallthrough
CT: control target
= control target key end

     0   :  { %vm151_vm0 = vcmask 195584   ;;  %vm572_vm1 = vcmask 1040384   ;;  %s750_s22 = smov 16   ;;  %s751_s23 = smov 32   ;;  %s1427_s1 = inlined_call_operand.vmem [shape: f32[408,256], index: 1, kind: input, shape index: {}]   ;;  %s1428_s0 = inlined_call_operand.vmem [shape: f32[64,408], index: 0, kind: input, shape index: {}]   ;;  %s1429_s2 = inlined_call_operand.vmem [shape: f32[1,256], index: 2, kind: input, shape index: {}]   ;;  %s1430_s3 = inlined_call_operand.vmem [shape: f32[1,256], index: 3, kind: input, shape index: {}]   ;;  %s1431_s4 = inlined_call_operand.vmem [shape: f32[64,256], index: 4, kind: output, shape index: {}]  }
   0x1   :  { %v143_v0 = vld [vmem:[%s1427_s1 + $0x2f0] sm:$0xff]  ;;  %v141_v3 = vld [vmem:[%s1427_s1 + $0x2e0] sm:$0xff]  ;;  %v871_v30 = vld [vmem:[%s1428_s0 + $0x18] sm:$0xff]  ;;  %s752_s24 = smov 64  }
   0x2   :  { %v79_v1 = vld [vmem:[%s1427_s1 + $0xf0] sm:$0xff]  ;;  %258 = vmatpush.msra.mxu2 %v143_v0  ;;  %v77_v4 = vld [vmem:[%s1427_s1 + $0xe0] sm:$0xff]  ;;  %v80_v34 = vld [vmem:[%s1427_s1 + $0xf8] sm:$0xff] }
   0x3   :  { %v111_v2 = vld [vmem:[%s1427_s1 + $0x1f0] sm:$0xff]  ;;  %176 = vmatpush.msra.mxu0 %v79_v1  ;;  %v109_v5 = vld [vmem:[%s1427_s1 + $0x1e0] sm:$0xff]  ;;  %v78_v38 = vld [vmem:[%s1427_s1 + $0xe8] sm:$0xff] }
   0x4   :  { %217 = vmatpush.msra.mxu1 %v111_v2  ;;  %v139_v6 = vld [vmem:[%s1427_s1 + $0x2d0] sm:$0xff]  ;;  %259 = vmatpush.msra.mxu2 %v141_v3  ;;  %v137_v9 = vld [vmem:[%s1427_s1 + $0x2c0] sm:$0xff]  ;;  %v76_v42 = vld [vmem:[%s1427_s1 + $0xd8] sm:$0xff] }
   0x5   :  { %v75_v7 = vld [vmem:[%s1427_s1 + $0xd0] sm:$0xff]  ;;  %177 = vmatpush.msra.mxu0 %v77_v4  ;;  %v73_v10 = vld [vmem:[%s1427_s1 + $0xc0] sm:$0xff]  ;;  %v923_v46 = vld [vmem:[%s1428_s0 + $0x38] sm:$0xff] }
   0x6   :  { %v107_v8 = vld [vmem:[%s1427_s1 + $0x1d0] sm:$0xff]  ;;  %218 = vmatpush.msra.mxu1 %v109_v5  ;;  %260 = vmatpush.msra.mxu2 %v139_v6  ;;  %v105_v11 = vld [vmem:[%s1427_s1 + $0x1c0] sm:$0xff]  ;;  %v74_v50 = vld [vmem:[%s1427_s1 + $0xc8] sm:$0xff] }
   0x7   :  { %178 = vmatpush.msra.mxu0 %v75_v7  ;;  %v135_v12 = vld [vmem:[%s1427_s1 + $0x2b0] sm:$0xff]  ;;  %v133_v15 = vld [vmem:[%s1427_s1 + $0x2a0] sm:$0xff]  ;;  %v72_v54 = vld [vmem:[%s1427_s1 + $0xb8] sm:$0xff] }
   0x8   :  { %219 = vmatpush.msra.mxu1 %v107_v8  ;;  %v71_v13 = vld [vmem:[%s1427_s1 + $0xb0] sm:$0xff]  ;;  %261 = vmatpush.msra.mxu2 %v137_v9  ;;  %v69_v16 = vld [vmem:[%s1427_s1 + $0xa0] sm:$0xff]  ;;  %v150_v59 = vld [vmem:[%s1427_s1 + $0x328] sm:$0xff] }
   0x9   :  { %179 = vmatpush.msra.mxu0 %v73_v10  ;;  %v103_v14 = vld [vmem:[%s1427_s1 + $0x1b0] sm:$0xff]  ;;  %v101_v17 = vld [vmem:[%s1427_s1 + $0x1a0] sm:$0xff]  ;;  %v976_v61 = vld [vmem:[%s1428_s0 + $0x8] sm:$0xff] }
   0xa   :  { %220 = vmatpush.msra.mxu1 %v105_v11  ;;  %262 = vmatpush.msra.mxu2 %v135_v12  ;;  %v131_v18 = vld [vmem:[%s1427_s1 + $0x290] sm:$0xff]  ;;  %v149_v21 = vld [vmem:[%s1427_s1 + $0x320] sm:$0xff]  ;;  %v112_v62 = vld [vmem:[%s1427_s1 + $0x1f8] sm:$0xff] }
   0xb   :  { %180 = vmatpush.msra.mxu0 %v71_v13  ;;  %v67_v19 = vld [vmem:[%s1427_s1 + $0x90] sm:$0xff]  ;;  %v129_v22 = vld [vmem:[%s1427_s1 + $0x280] sm:$0xff]  ;;  %312 = vmatpush.msra.mxu3 %v149_v21  ;;  %v144_v63 = vld [vmem:[%s1427_s1 + $0x2f8] sm:$0xff] }
   0xc   :  { %221 = vmatpush.msra.mxu1 %v103_v14  ;;  %263 = vmatpush.msra.mxu2 %v133_v15  ;;  %v99_v20 = vld [vmem:[%s1427_s1 + $0x190] sm:$0xff]  ;;  %v65_v23 = vld [vmem:[%s1427_s1 + $0x80] sm:$0xff]  ;;  %v988_v0 = vld [vmem:[%s1428_s0 + $0x58] sm:$0xff] }
   0xd   :  { %181 = vmatpush.msra.mxu0 %v69_v16  ;;  %v147_v24 = vld [vmem:[%s1427_s1 + $0x310] sm:$0xff]  ;;  %v97_v25 = vld [vmem:[%s1427_s1 + $0x180] sm:$0xff]  ;;  %v110_v1 = vld [vmem:[%s1427_s1 + $0x1e8] sm:$0xff] }
   0xe   :  { %222 = vmatpush.msra.mxu1 %v101_v17  ;;  %264 = vmatpush.msra.mxu2 %v131_v18  ;;  %v127_v26 = vld [vmem:[%s1427_s1 + $0x270] sm:$0xff]  ;;  %v145_v28 = vld [vmem:[%s1427_s1 + $0x300] sm:$0xff]  ;;  %v70_v2 = vld [vmem:[%s1427_s1 + $0xa8] sm:$0xff] }
   0xf   :  { %182 = vmatpush.msra.mxu0 %v67_v19  ;;  %v63_v27 = vld [vmem:[%s1427_s1 + $0x70] sm:$0xff]  ;;  %313 = vmatpush.msra.mxu3 %v147_v24  ;;  %v125_v31 = vld [vmem:[%s1427_s1 + $0x260] sm:$0xff]  ;;  %v142_v3 = vld [vmem:[%s1427_s1 + $0x2e8] sm:$0xff] }
  0x10   :  { %223 = vmatpush.msra.mxu1 %v99_v20  ;;  %265 = vmatpush.msra.mxu2 %v129_v22  ;;  %v95_v29 = vld [vmem:[%s1427_s1 + $0x170] sm:$0xff]  ;;  %v61_v32 = vld [vmem:[%s1427_s1 + $0x60] sm:$0xff]  ;;  %v148_v4 = vld [vmem:[%s1427_s1 + $0x318] sm:$0xff] }
  0x11   :  { %183 = vmatpush.msra.mxu0 %v65_v23  ;;  %314 = vmatpush.msra.mxu3 %v145_v28  ;;  %v93_v33 = vld [vmem:[%s1427_s1 + $0x160] sm:$0xff]  ;;  %v123_v35 = vld [vmem:[%s1427_s1 + $0x250] sm:$0xff]  ;;  %v108_v5 = vld [vmem:[%s1427_s1 + $0x1d8] sm:$0xff] }
  0x12   :  { %224 = vmatpush.msra.mxu1 %v97_v25  ;;  %266 = vmatpush.msra.mxu2 %v127_v26  ;;  %v59_v36 = vld [vmem:[%s1427_s1 + $0x50] sm:$0xff]  ;;  %v121_v39 = vld [vmem:[%s1427_s1 + $0x240] sm:$0xff]  ;;  %v68_v6 = vld [vmem:[%s1427_s1 + $0x98] sm:$0xff] }
  0x13   :  { %184 = vmatpush.msra.mxu0 %v63_v27  ;;  %727 = vmatmul.msk.f32.vlgmr.msra.gmra.mxu3 %vm151_vm0, %v871_v30  ;;  %v91_v37 = vld [vmem:[%s1427_s1 + $0x150] sm:$0xff]  ;;  %v57_v40 = vld [vmem:[%s1427_s1 + $0x40] sm:$0xff]  ;;  %v140_v7 = vld [vmem:[%s1427_s1 + $0x2d8] sm:$0xff] }
  0x14   :  { %225 = vmatpush.msra.mxu1 %v95_v29  ;;  %267 = vmatpush.msra.mxu2 %v125_v31  ;;  %v89_v41 = vld [vmem:[%s1427_s1 + $0x140] sm:$0xff]  ;;  %v119_v43 = vld [vmem:[%s1427_s1 + $0x230] sm:$0xff]  ;;  %v106_v9 = vld [vmem:[%s1427_s1 + $0x1c8] sm:$0xff] }
  0x15   :  { %185 = vmatpush.msra.mxu0 %v61_v32  ;;  %340 = vmatpush.msrb.mxu3 %v80_v34  ;;  %v55_v44 = vld [vmem:[%s1427_s1 + $0x30] sm:$0xff]  ;;  %v117_v47 = vld [vmem:[%s1427_s1 + $0x220] sm:$0xff]  ;;  %v138_v11 = vld [vmem:[%s1427_s1 + $0x2c8] sm:$0xff] }
  0x16   :  { %226 = vmatpush.msra.mxu1 %v93_v33  ;;  %268 = vmatpush.msra.mxu2 %v123_v35  ;;  %v87_v45 = vld [vmem:[%s1427_s1 + $0x130] sm:$0xff]  ;;  %v53_v48 = vld [vmem:[%s1427_s1 + $0x20] sm:$0xff]  ;;  %v1034_v12 = vld [vmem:[%s1428_s0 + $0x28] sm:$0xff] }
  0x17   :  { %186 = vmatpush.msra.mxu0 %v59_v36  ;;  %341 = vmatpush.msrb.mxu3 %v78_v38  ;;  %v85_v49 = vld [vmem:[%s1427_s1 + $0x120] sm:$0xff]  ;;  %v115_v51 = vld [vmem:[%s1427_s1 + $0x210] sm:$0xff]  ;;  %v104_v13 = vld [vmem:[%s1427_s1 + $0x1b8] sm:$0xff] }
  0x18   :  { %227 = vmatpush.msra.mxu1 %v91_v37  ;;  %269 = vmatpush.msra.mxu2 %v121_v39  ;;  %v51_v52 = vld [vmem:[%s1427_s1 + $0x10] sm:$0xff]  ;;  %v113_v55 = vld [vmem:[%s1427_s1 + $0x200] sm:$0xff]  ;;  %v1043_v14 = vld [vmem:[%s1428_s0 + $0x78] sm:$0xff] }
  0x19   :  { %187 = vmatpush.msra.mxu0 %v57_v40  ;;  %342 = vmatpush.msrb.mxu3 %v76_v42  ;;  %v83_v53 = vld [vmem:[%s1427_s1 + $0x110] sm:$0xff]  ;;  %v49_v56 = vld [vmem:[%s1427_s1] sm:$0xff]  ;;  %v136_v15 = vld [vmem:[%s1427_s1 + $0x2b8] sm:$0xff] }
  0x1a   :  { %228 = vmatpush.msra.mxu1 %v89_v41  ;;  %270 = vmatpush.msra.mxu2 %v119_v43  ;;  %v960_v57 = vld [vmem:[%s1428_s0 + $0x10] sm:$0xff]  ;;  %v81_v58 = vld [vmem:[%s1427_s1 + $0x100] sm:$0xff]  ;;  %v102_v16 = vld [vmem:[%s1427_s1 + $0x1a8] sm:$0xff] }
  0x1b   :  { %188 = vmatpush.msra.mxu0 %v55_v44  ;;  %728 = vmatmul.msk.f32.gmra.mxu3 %vm151_vm0, %v923_v46  ;;  %v971_v60 = vld [vmem:[%s1428_s0] sm:$0xff]  ;;  %v1018_v8 = vld [vmem:[%s1428_s0 + $0x30] sm:$0xff]  ;;  %v66_v17 = vld [vmem:[%s1427_s1 + $0x88] sm:$0xff] }
  0x1c   :  { %229 = vmatpush.msra.mxu1 %v87_v45  ;;  %271 = vmatpush.msra.mxu2 %v117_v47  ;;  %v1026_v10 = vld [vmem:[%s1428_s0 + $0x20] sm:$0xff]  ;;  %v134_v18 = vld [vmem:[%s1427_s1 + $0x2a8] sm:$0xff]  ;;  %v100_v20 = vld [vmem:[%s1427_s1 + $0x198] sm:$0xff] }
  0x1d   :  { %189 = vmatpush.msra.mxu0 %v53_v48  ;;  %343 = vmatpush.msrb.mxu3 %v74_v50  ;;  %v146_v19 = vld [vmem:[%s1427_s1 + $0x308] sm:$0xff]  ;;  %v64_v21 = vld [vmem:[%s1427_s1 + $0x78] sm:$0xff]  ;;  %v1076_v23 = vld [vmem:[%s1428_s0 + $0x50] sm:$0xff] }
  0x1e   :  { %230 = vmatpush.msra.mxu1 %v85_v49  ;;  %272 = vmatpush.msra.mxu2 %v115_v51  ;;  %v132_v22 = vld [vmem:[%s1427_s1 + $0x298] sm:$0xff]  ;;  %v98_v24 = vld [vmem:[%s1427_s1 + $0x188] sm:$0xff]  ;;  %v1084_v25 = vld [vmem:[%s1428_s0 + $0x40] sm:$0xff] }
  0x1f   :  { %190 = vmatpush.msra.mxu0 %v51_v52  ;;  %344 = vmatpush.msrb.mxu3 %v72_v54  ;;  %v62_v26 = vld [vmem:[%s1427_s1 + $0x68] sm:$0xff]  ;;  %v96_v28 = vld [vmem:[%s1427_s1 + $0x178] sm:$0xff]  ;;  %v1131_v38 = vld [vmem:[%s1428_s0 + $0x70] sm:$0xff] }
  0x20   :  { %231 = vmatpush.msra.mxu1 %v83_v53  ;;  %273 = vmatpush.msra.mxu2 %v113_v55  ;;  %v1092_v27 = vld [vmem:[%s1428_s0 + $0x48] sm:$0xff]  ;;  %v1101_v29 = vld [vmem:[%s1428_s0 + $0x98] sm:$0xff]  ;;  %v1139_v40 = vld [vmem:[%s1428_s0 + $0x60] sm:$0xff] }
  0x21   :  { %191 = vmatpush.msra.mxu0 %v49_v56  ;;  %274 = vmatmul.f32.vlgmr.msra.gmra.mxu2 %v960_v57  ;;  %v130_v31 = vld [vmem:[%s1427_s1 + $0x288] sm:$0xff]  ;;  %v60_v32 = vld [vmem:[%s1427_s1 + $0x58] sm:$0xff]  ;;  %v35_v53 = vld [vmem:[%s1428_s0 + $0x90] sm:$0xff] }
  0x22   :  { %232 = vmatpush.msra.mxu1 %v81_v58  ;;  %476 = vmatpush.msrb.mxu2 %v150_v59  ;;  %v94_v33 = vld [vmem:[%s1427_s1 + $0x168] sm:$0xff]  ;;  %v128_v34 = vld [vmem:[%s1427_s1 + $0x278] sm:$0xff]  ;;  %v33_v55 = vld [vmem:[%s1428_s0 + $0x80] sm:$0xff] }
  0x23   :  { %192 = vmatmul.f32.vlgmr.msra.gmra.mxu0 %v971_v60  ;;  %233 = vmatmul.f32.vlgmr.msra.gmra.mxu1 %v976_v61  ;;  %v58_v35 = vld [vmem:[%s1427_s1 + $0x48] sm:$0xff]  ;;  %v92_v36 = vld [vmem:[%s1427_s1 + $0x158] sm:$0xff] }
  0x24   :  { %381 = vmatpush.msrb.mxu0 %v112_v62  ;;  %422 = vmatpush.msrb.mxu1 %v144_v63  ;;  %v126_v37 = vld [vmem:[%s1427_s1 + $0x268] sm:$0xff]  ;;  %v56_v39 = vld [vmem:[%s1427_s1 + $0x38] sm:$0xff] }
  0x25   :  { %729 = vmatmul.msk.f32.gmra.mxu3 %vm151_vm0, %v988_v0  ;;  %477 = vmatpush.msrb.mxu2 %v148_v4  ;;  %v124_v41 = vld [vmem:[%s1427_s1 + $0x258] sm:$0xff]  ;;  %v1147_v42 = vld [vmem:[%s1428_s0 + $0x68] sm:$0xff] }
  0x26   :  { %382 = vmatpush.msrb.mxu0 %v110_v1  ;;  %345 = vmatpush.msrb.mxu3 %v70_v2  ;;  %v90_v43 = vld [vmem:[%s1427_s1 + $0x148] sm:$0xff]  ;;  %v1156_v44 = vld [vmem:[%s1428_s0 + $0xb8] sm:$0xff]  ;;  %v39_v2 = vld [vmem:[%s1428_s0 + $0xb0] sm:$0xff] }
  0x27   :  { %423 = vmatpush.msrb.mxu1 %v142_v3  ;;  %478 = vmatpush.msrb.mxu2 %v146_v19  ;;  %v122_v45 = vld [vmem:[%s1427_s1 + $0x248] sm:$0xff]  ;;  %v88_v48 = vld [vmem:[%s1427_s1 + $0x138] sm:$0xff]  ;;  %v37_v3 = vld [vmem:[%s1428_s0 + $0xa0] sm:$0xff] }
  0x28   :  { %383 = vmatpush.msrb.mxu0 %v108_v5  ;;  %346 = vmatpush.msrb.mxu3 %v68_v6  ;;  %v54_v47 = vld [vmem:[%s1427_s1 + $0x28] sm:$0xff]  ;;  %v120_v49 = vld [vmem:[%s1427_s1 + $0x238] sm:$0xff]  ;;  %v43_v6 = vld [vmem:[%s1428_s0 + $0xd0] sm:$0xff] }
  0x29   :  { %424 = vmatpush.msrb.mxu1 %v140_v7  ;;  %277 = vmatmul.f32.gmra.mxu2 %v1018_v8  ;;  %v52_v50 = vld [vmem:[%s1427_s1 + $0x18] sm:$0xff]  ;;  %v86_v51 = vld [vmem:[%s1427_s1 + $0x128] sm:$0xff]  ;;  %v41_v7 = vld [vmem:[%s1428_s0 + $0xc0] sm:$0xff] }
  0x2a   :  { %384 = vmatpush.msrb.mxu0 %v106_v9  ;;  %347 = vmatpush.msrb.mxu3 %v66_v17  ;;  %v118_v52 = vld [vmem:[%s1427_s1 + $0x228] sm:$0xff]  ;;  %v116_v56 = vld [vmem:[%s1427_s1 + $0x218] sm:$0xff] }
  0x2b   :  { %195 = vmatmul.f32.gmra.mxu0 %v1026_v10  ;;  %425 = vmatpush.msrb.mxu1 %v138_v11  ;;  %v50_v54 = vld [vmem:[%s1427_s1 + $0x8] sm:$0xff]  ;;  %v84_v59 = vld [vmem:[%s1427_s1 + $0x118] sm:$0xff]  ;;  %v47_v11 = vld [vmem:[%s1428_s0 + $0xf0] sm:$0xff] }
  0x2c   :  { %236 = vmatmul.f32.gmra.mxu1 %v1034_v12  ;;  %385 = vmatpush.msrb.mxu0 %v104_v13  ;;  %v34_v58 = vld [vmem:[%s1428_s0 + $0x88] sm:$0xff]  ;;  %v44_v62 = vld [vmem:[%s1428_s0 + $0xd8] sm:$0xff]  ;;  %v45_v13 = vld [vmem:[%s1428_s0 + $0xe0] sm:$0xff] }
  0x2d   :  { %730 = vmatmul.msk.f32.gmra.mxu3 %vm151_vm0, %v1043_v14  ;;  %426 = vmatpush.msrb.mxu1 %v136_v15  ;;  %v114_v63 = vld [vmem:[%s1427_s1 + $0x208] sm:$0xff]  ;;  %v48_v5 = vld [vmem:[%s1428_s0 + $0xf8] sm:$0xff] }
  0x2e   :  { %386 = vmatpush.msrb.mxu0 %v102_v16  ;;  %348 = vmatpush.msrb.mxu3 %v64_v21  ;;  %v82_v1 = vld [vmem:[%s1427_s1 + $0x108] sm:$0xff] }
  0x2f   :  { %427 = vmatpush.msrb.mxu1 %v134_v18  ;;  %v38_v4 = vld [vmem:[%s1428_s0 + $0xa8] sm:$0xff] }
  0x30   :  { %387 = vmatpush.msrb.mxu0 %v100_v20  ;;  %349 = vmatpush.msrb.mxu3 %v62_v26  ;;  %v42_v9 = vld [vmem:[%s1428_s0 + $0xc8] sm:$0xff] }
  0x31   :  { %428 = vmatpush.msrb.mxu1 %v132_v22  ;;  %280 = vmatmul.f32.gmra.mxu2 %v1076_v23  ;;  %v46_v15 = vld [vmem:[%s1428_s0 + $0xe8] sm:$0xff]  ;;  %s749_s0 = smov 8  }
  0x32   :  { %388 = vmatpush.msrb.mxu0 %v98_v24  ;;  %350 = vmatpush.msrb.mxu3 %v60_v32 }
  0x33   :  { %198 = vmatmul.f32.gmra.mxu0 %v1084_v25  ;;  %429 = vmatpush.msrb.mxu1 %v130_v31 }
  0x34   :  { %239 = vmatmul.f32.gmra.mxu1 %v1092_v27  ;;  %389 = vmatpush.msrb.mxu0 %v96_v28 }
  0x35   :  { %731 = vmatmul.msk.f32.gmra.mxu3 %vm151_vm0, %v1101_v29  ;;  %430 = vmatpush.msrb.mxu1 %v128_v34 }
  0x36   :  { %390 = vmatpush.msrb.mxu0 %v94_v33  ;;  %351 = vmatpush.msrb.mxu3 %v58_v35 }
  0x37   :  { %431 = vmatpush.msrb.mxu1 %v126_v37 }
  0x38   :  { %391 = vmatpush.msrb.mxu0 %v92_v36  ;;  %352 = vmatpush.msrb.mxu3 %v56_v39 }
  0x39   :  { %283 = vmatmul.f32.gmra.mxu2 %v1131_v38  ;;  %432 = vmatpush.msrb.mxu1 %v124_v41 }
  0x3a   :  { %392 = vmatpush.msrb.mxu0 %v90_v43  ;;  %353 = vmatpush.msrb.mxu3 %v54_v47 }
  0x3b   :  { %201 = vmatmul.f32.gmra.mxu0 %v1139_v40  ;;  %433 = vmatpush.msrb.mxu1 %v122_v45 }
  0x3c   :  { %242 = vmatmul.f32.gmra.mxu1 %v1147_v42  ;;  %393 = vmatpush.msrb.mxu0 %v88_v48 }
  0x3d   :  { %732 = vmatmul.msk.f32.gmra.mxu3 %vm151_vm0, %v1156_v44  ;;  %434 = vmatpush.msrb.mxu1 %v120_v49 }
  0x3e   :  { %354 = vmatpush.msrb.mxu3 %v52_v50  ;;  %394 = vmatpush.msrb.mxu0 %v86_v51 }
  0x3f   :  { %435 = vmatpush.msrb.mxu1 %v118_v52 }
  0x40   :  { %355 = vmatpush.msrb.mxu3 %v50_v54  ;;  %395 = vmatpush.msrb.mxu0 %v84_v59 }
  0x41   :  { %286 = vmatmul.f32.gmra.mxu2 %v35_v53  ;;  %436 = vmatpush.msrb.mxu1 %v116_v56 }
  0x42   :  { %396 = vmatpush.msrb.mxu0 %v82_v1 }
  0x43   :  { %204 = vmatmul.f32.gmra.mxu0 %v33_v55  ;;  %437 = vmatpush.msrb.mxu1 %v114_v63 }
  0x44   :  { %245 = vmatmul.f32.gmra.mxu1 %v34_v58 }
  0x45   :  { %733 = vmatmul.msk.f32.gmra.mxu3 %vm151_vm0, %v44_v62 }
  0x49   :  { %289 = vmatmul.f32.gmra.mxu2 %v39_v2 }
  0x4b   :  { %207 = vmatmul.f32.gmra.mxu0 %v37_v3 }
  0x4c   :  { %248 = vmatmul.f32.gmra.mxu1 %v38_v4 }
  0x4d   :  { %734 = vmatmul.msk.f32.gmra.mxu3 %vm151_vm0, %v48_v5 }
  0x51   :  { %292 = vmatmul.f32.gmra.mxu2 %v43_v6 }
  0x53   :  { %210 = vmatmul.f32.gmra.mxu0 %v41_v7 }
  0x54   :  { %251 = vmatmul.f32.gmra.mxu1 %v42_v9 }
  0x55   :  { %356 = vmatmul.f32.vlgmr.msrb.gmra.mxu3 %v971_v60 }
  0x59   :  { %295 = vmatmul.f32.gmra.mxu2 %v47_v11 }
  0x5b   :  { %213 = vmatmul.f32.gmra.mxu0 %v45_v13 }
  0x5c   :  { %254 = vmatmul.f32.gmra.mxu1 %v46_v15 }
  0x5d   :  { %359 = vmatmul.f32.gmra.mxu3 %v1026_v10 }
  0x61   :  { %735 = vmatmul.msk.f32.vlgmr.msrb.gmra.mxu2 %vm151_vm0, %v871_v30 }
  0x63   :  { %397 = vmatmul.f32.vlgmr.msrb.gmra.mxu0 %v976_v61 }
  0x64   :  { %438 = vmatmul.f32.vlgmr.msrb.gmra.mxu1 %v960_v57 }
  0x65   :  { %362 = vmatmul.f32.gmra.mxu3 %v1084_v25 }
  0x69   :  { %736 = vmatmul.msk.f32.gmra.mxu2 %vm151_vm0, %v923_v46 }
  0x6b   :  { %400 = vmatmul.f32.gmra.mxu0 %v1034_v12 }
  0x6c   :  { %441 = vmatmul.f32.gmra.mxu1 %v1018_v8 }
  0x6d   :  { %365 = vmatmul.f32.gmra.mxu3 %v1139_v40 }
  0x71   :  { %737 = vmatmul.msk.f32.gmra.mxu2 %vm151_vm0, %v988_v0 }
  0x73   :  { %403 = vmatmul.f32.gmra.mxu0 %v1092_v27 }
  0x74   :  { %444 = vmatmul.f32.gmra.mxu1 %v1076_v23 }
  0x75   :  { %368 = vmatmul.f32.gmra.mxu3 %v33_v55 }
  0x79   :  { %738 = vmatmul.msk.f32.gmra.mxu2 %vm151_vm0, %v1043_v14 }
  0x7b   :  { %406 = vmatmul.f32.gmra.mxu0 %v1147_v42 }
  0x7c   :  { %447 = vmatmul.f32.gmra.mxu1 %v1131_v38 }
  0x7d   :  { %371 = vmatmul.f32.gmra.mxu3 %v37_v3 }
  0x81   :  { %739 = vmatmul.msk.f32.gmra.mxu2 %vm151_vm0, %v1101_v29 }
  0x83   :  { %409 = vmatmul.f32.gmra.mxu0 %v34_v58 }
  0x84   :  { %450 = vmatmul.f32.gmra.mxu1 %v35_v53 }
  0x85   :  { %374 = vmatmul.f32.gmra.mxu3 %v41_v7 }
  0x89   :  { %740 = vmatmul.msk.f32.gmra.mxu2 %vm151_vm0, %v1156_v44 }
  0x8b   :  { %412 = vmatmul.f32.gmra.mxu0 %v38_v4 }
  0x8c   :  { %453 = vmatmul.f32.gmra.mxu1 %v39_v2 }
  0x8d   :  { %377 = vmatmul.f32.gmra.mxu3 %v45_v13 }
  0x91   :  { %741 = vmatmul.msk.f32.gmra.mxu2 %vm151_vm0, %v44_v62 }
  0x93   :  { %415 = vmatmul.f32.gmra.mxu0 %v42_v9 }
  0x94   :  { %456 = vmatmul.f32.gmra.mxu1 %v43_v6 }
  0x96   :  { %v316_v30 = vpop.f32.mrf.mxu3 }
  0x99   :  { %742 = vmatmul.msk.f32.gmra.mxu2 %vm151_vm0, %v48_v5 }
  0x9b   :  { %418 = vmatmul.f32.gmra.mxu0 %v46_v15 }
  0x9c   :  { %459 = vmatmul.f32.gmra.mxu1 %v47_v11 }
  0x9e   :  { %v319_v46 = vpop.f32.mrf.mxu3 }
  0xa0   :  { %v193_v57 = vpop.f32.mrf.mxu0  ;;  %v234_v60 = vpop.f32.mrf.mxu1 }
  0xa1   :  { %v235_v32 = vadd.f32 %v234_v60, %v193_v57 }
  0xa4   :  { %v275_v61 = vpop.f32.mrf.mxu2 }
  0xa5   :  { %v276_v35 = vadd.f32 %v275_v61, %v235_v32 }
  0xa7   :  { %v1270_v44 = vadd.f32 %v316_v30, %v276_v35 }
  0xa8   :  { %v196_v0 = vpop.f32.mrf.mxu0  ;;  %v322_v8 = vpop.f32.mrf.mxu3 }
  0xa9   :  { %v237_v10 = vpop.f32.mrf.mxu1  ;;  %v530_v54 = vmul.f32 %v1270_v44, %v1270_v44 }
  0xaa   :  { %v238_v31 = vadd.f32 %v237_v10, %v196_v0 }
  0xac   :  { %v278_v12 = vpop.f32.mrf.mxu2 }
  0xad   :  { %v279_v33 = vadd.f32 %v278_v12, %v238_v31 }
  0xaf   :  { %v1268_v39 = vadd.f32 %v319_v46, %v279_v33 }
  0xb0   :  { %v199_v14 = vpop.f32.mrf.mxu0  ;;  %v325_v16 = vpop.f32.mrf.mxu3 }
  0xb1   :  { %v240_v17 = vpop.f32.mrf.mxu1  ;;  %v532_v50 = vmul.f32 %v1268_v39, %v1268_v39  ;;  %v504_v56 = vadd.f32 %v1268_v39, %v1270_v44 }
  0xb2   :  { %v241_v34 = vadd.f32 %v240_v17, %v199_v14 }
  0xb3   :  { %v546_v63 = vadd.f32 %v532_v50, %v530_v54 }
  0xb4   :  { %v281_v18 = vpop.f32.mrf.mxu2 }
  0xb5   :  { %v282_v37 = vadd.f32 %v281_v18, %v241_v34 }
  0xb7   :  { %v1272_v47 = vadd.f32 %v322_v8, %v282_v37 }
  0xb8   :  { %v202_v19 = vpop.f32.mrf.mxu0  ;;  %v328_v20 = vpop.f32.mrf.mxu3 }
  0xb9   :  { %v243_v21 = vpop.f32.mrf.mxu1  ;;  %v534_v58 = vmul.f32 %v1272_v47, %v1272_v47  ;;  %v505_v1 = vadd.f32 %v504_v56, %v1272_v47 }
  0xba   :  { %v244_v38 = vadd.f32 %v243_v21, %v202_v19 }
  0xbb   :  { %v547_v7 = vadd.f32 %v546_v63, %v534_v58 }
  0xbc   :  { %v284_v22 = vpop.f32.mrf.mxu2 }
  0xbd   :  { %v285_v40 = vadd.f32 %v284_v22, %v244_v38 }
  0xbf   :  { %v1276_v51 = vadd.f32 %v325_v16, %v285_v40 }
  0xc0   :  { %v205_v23 = vpop.f32.mrf.mxu0  ;;  %v331_v24 = vpop.f32.mrf.mxu3 }
  0xc1   :  { %v246_v25 = vpop.f32.mrf.mxu1  ;;  %v536_v2 = vmul.f32 %v1276_v51, %v1276_v51  ;;  %v506_v9 = vadd.f32 %v505_v1, %v1276_v51 }
  0xc2   :  { %v247_v41 = vadd.f32 %v246_v25, %v205_v23 }
  0xc3   :  { %v548_v15 = vadd.f32 %v547_v7, %v536_v2 }
  0xc4   :  { %v287_v26 = vpop.f32.mrf.mxu2 }
  0xc5   :  { %v288_v48 = vadd.f32 %v287_v26, %v247_v41 }
  0xc7   :  { %v1284_v59 = vadd.f32 %v328_v20, %v288_v48 }
  0xc8   :  { %v208_v27 = vpop.f32.mrf.mxu0  ;;  %v334_v28 = vpop.f32.mrf.mxu3 }
  0xc9   :  { %v249_v29 = vpop.f32.mrf.mxu1  ;;  %v538_v11 = vmul.f32 %v1284_v59, %v1284_v59  ;;  %v507_v30 = vadd.f32 %v506_v9, %v1284_v59 }
  0xca   :  { %v250_v49 = vadd.f32 %v249_v29, %v208_v27 }
  0xcb   :  { %v549_v61 = vadd.f32 %v548_v15, %v538_v11 }
  0xcc   :  { %v290_v36 = vpop.f32.mrf.mxu2 }
  0xcd   :  { %v291_v52 = vadd.f32 %v290_v36, %v250_v49 }
  0xcf   :  { %v1289_v3 = vadd.f32 %v331_v24, %v291_v52 }
  0xd0   :  { %v211_v42 = vpop.f32.mrf.mxu0  ;;  %v337_v43 = vpop.f32.mrf.mxu3 }
  0xd1   :  { %v252_v45 = vpop.f32.mrf.mxu1  ;;  %v540_v46 = vmul.f32 %v1289_v3, %v1289_v3  ;;  %v508_v0 = vadd.f32 %v507_v30, %v1289_v3 }
  0xd2   :  { %v253_v53 = vadd.f32 %v252_v45, %v211_v42 }
  0xd3   :  { %v550_v12 = vadd.f32 %v549_v61, %v540_v46 }
  0xd4   :  { %v293_v55 = vpop.f32.mrf.mxu2 }
  0xd5   :  { %v294_v62 = vadd.f32 %v293_v55, %v253_v53 }
  0xd7   :  { %v1294_v13 = vadd.f32 %v334_v28, %v294_v62 }
  0xd8   :  { %v214_v4 = vpop.f32.mrf.mxu0  ;;  %v357_v5 = vpop.f32.mrf.mxu3 }
  0xd9   :  { %v255_v6 = vpop.f32.mrf.mxu1  ;;  %v542_v8 = vmul.f32 %v1294_v13, %v1294_v13  ;;  %v509_v14 = vadd.f32 %v508_v0, %v1294_v13 }
  0xda   :  { %v256_v57 = vadd.f32 %v255_v6, %v214_v4 }
  0xdb   :  { %v551_v20 = vadd.f32 %v550_v12, %v542_v8 }
  0xdc   :  { %v296_v60 = vpop.f32.mrf.mxu2 }
  0xdd   :  { %v297_v10 = vadd.f32 %v296_v60, %v256_v57 }
  0xdf   :  { %v1303_v16 = vadd.f32 %v337_v43, %v297_v10 }
  0xe0   :  { %v398_v17 = vpop.f32.mrf.mxu0  ;;  %v360_v18 = vpop.f32.mrf.mxu3 }
  0xe1   :  { %v439_v19 = vpop.f32.mrf.mxu1  ;;  %v510_v21 = vadd.f32 %v509_v14, %v1303_v16  ;;  %v544_v22 = vmul.f32 %v1303_v16, %v1303_v16  ;;  %v399_v2 = vadd.f32 %v398_v17, %v357_v5 }
  0xe3   :  { %v511_v23 = vrot.slane %v510_v21, 4  ;;  %v552_v24 = vadd.f32 %v551_v20, %v544_v22  ;;  %v440_v15 = vadd.f32 %v439_v19, %v399_v2 }
  0xe4   :  { %v480_v25 = vpop.f32.mrf.mxu2 }
  0xe5   :  { %v512_v26 = vadd.f32 %v511_v23, %v510_v21  ;;  %v553_v27 = vrot.slane %v552_v24, 4  ;;  %v1315_v10 = vadd.f32 %v480_v25, %v440_v15 }
  0xe7   :  { %v513_v31 = vrot.slane %v512_v26, 2  ;;  %v554_v32 = vadd.f32 %v553_v27, %v552_v24  ;;  %v531_v22 = vmul.f32 %v1315_v10, %v1315_v10 }
  0xe8   :  { %v401_v28 = vpop.f32.mrf.mxu0  ;;  %v363_v29 = vpop.f32.mrf.mxu3 }
  0xe9   :  { %v442_v33 = vpop.f32.mrf.mxu1  ;;  %v514_v34 = vadd.f32 %v513_v31, %v512_v26  ;;  %v555_v35 = vrot.slane %v554_v32, 2  ;;  %v402_v1 = vadd.f32 %v401_v28, %v360_v18 }
  0xeb   :  { %v515_v36 = vrot.slane %v514_v34, 1  ;;  %v556_v37 = vadd.f32 %v555_v35, %v554_v32  ;;  %v443_v9 = vadd.f32 %v442_v33, %v402_v1 }
  0xec   :  { %v483_v38 = vpop.f32.mrf.mxu2 }
  0xed   :  { %v557_v40 = vrot.slane %v556_v37, 1  ;;  %v516_v42 = vadd.f32 %v515_v36, %v514_v34  ;;  %v1313_v61 = vadd.f32 %v483_v38, %v443_v9 }
  0xef   :  { %v558_v43 = vadd.f32 %v557_v40, %v556_v37  ;;  %v533_v20 = vmul.f32 %v1313_v61, %v1313_v61  ;;  %v517_v23 = vadd.f32 %v1313_v61, %v1315_v10 }
  0xf0   :  { %v404_v41 = vpop.f32.mrf.mxu0  ;;  %v366_v45 = vpop.f32.mrf.mxu3 }
  0xf1   :  { %v445_v48 = vpop.f32.mrf.mxu1  ;;  %v1309_v49 = vsel %vm572_vm1, %v516_v42, %v558_v43  ;;  %v405_v4 = vadd.f32 %v404_v41, %v363_v29  ;;  %v559_v28 = vadd.f32 %v533_v20, %v531_v22 }
  0xf2   :  { %575 = vrot.lane.b32.xlu0 %v1309_v49, %s749_s0 }
  0xf3   :  { %v446_v30 = vadd.f32 %v445_v48, %v405_v4 }
  0xf4   :  { %v486_v50 = vpop.f32.mrf.mxu2 }
  0xf5   :  { %v1317_v12 = vadd.f32 %v486_v50, %v446_v30 }
  0xf7   :  { %v535_v24 = vmul.f32 %v1317_v12, %v1317_v12  ;;  %v518_v29 = vadd.f32 %v517_v23, %v1317_v12 }
  0xf8   :  { %v407_v52 = vpop.f32.mrf.mxu0  ;;  %v369_v53 = vpop.f32.mrf.mxu3 }
  0xf9   :  { %v448_v54 = vpop.f32.mrf.mxu1  ;;  %v408_v11 = vadd.f32 %v407_v52, %v366_v45  ;;  %v560_v34 = vadd.f32 %v559_v28, %v535_v24 }
  0xfb   :  { %v449_v0 = vadd.f32 %v448_v54, %v408_v11 }
  0xfc   :  { %v489_v55 = vpop.f32.mrf.mxu2 }
  0xfd   :  { %v1321_v19 = vadd.f32 %v489_v55, %v449_v0 }
  0xff   :  { %v537_v31 = vmul.f32 %v1321_v19, %v1321_v19  ;;  %v519_v35 = vadd.f32 %v518_v29, %v1321_v19 }
 0x100   :  { %v410_v56 = vpop.f32.mrf.mxu0  ;;  %v372_v62 = vpop.f32.mrf.mxu3 }
 0x101   :  { %v451_v58 = vpop.f32.mrf.mxu1  ;;  %v411_v46 = vadd.f32 %v410_v56, %v369_v53  ;;  %v561_v42 = vadd.f32 %v560_v34, %v537_v31 }
 0x103   :  { %v452_v14 = vadd.f32 %v451_v58, %v411_v46 }
 0x104   :  { %v492_v63 = vpop.f32.mrf.mxu2 }
 0x105   :  { %v1329_v25 = vadd.f32 %v492_v63, %v452_v14 }
 0x107   :  { %v539_v36 = vmul.f32 %v1329_v25, %v1329_v25  ;;  %v520_v43 = vadd.f32 %v519_v35, %v1329_v25 }
 0x108   :  { %v413_v6 = vpop.f32.mrf.mxu0  ;;  %v375_v57 = vpop.f32.mrf.mxu3 }
 0x109   :  { %v454_v7 = vpop.f32.mrf.mxu1  ;;  %v414_v8 = vadd.f32 %v413_v6, %v372_v62  ;;  %v562_v50 = vadd.f32 %v561_v42, %v539_v36 }
 0x10b   :  { %v455_v21 = vadd.f32 %v454_v7, %v414_v8 }
 0x10c   :  { %v495_v60 = vpop.f32.mrf.mxu2 }
 0x10d   :  { %v1334_v32 = vadd.f32 %v495_v60, %v455_v21 }
 0x10f   :  { %v541_v45 = vmul.f32 %v1334_v32, %v1334_v32  ;;  %v521_v52 = vadd.f32 %v520_v43, %v1334_v32 }
 0x110   :  { %v416_v5 = vpop.f32.mrf.mxu0  ;;  %v378_v33 = vpop.f32.mrf.mxu3 }
 0x111   :  { %v417_v17 = vadd.f32 %v416_v5, %v375_v57  ;;  %v457_v18 = vpop.f32.mrf.mxu1  ;;  %v563_v55 = vadd.f32 %v562_v50, %v541_v45  ;;  %v579_v5 = vlaneseq }
 0x113   :  { %v458_v26 = vadd.f32 %v457_v18, %v417_v17  ;;  %v580_v18 = vand.u32 127, %v579_v5 }
 0x114   :  { %v498_v27 = vpop.f32.mrf.mxu2 }
 0x115   :  { %v1339_v37 = vadd.f32 %v498_v27, %v458_v26  ;;  %vm581_vm2 = vcmp.lt.s32.totalorder %v580_v18, 8  ;;  %vm590_vm3 = vcmp.lt.s32.totalorder %v580_v18, 16  ;;  %vm599_vm4 = vcmp.lt.s32.totalorder %v580_v18, 32 }
 0x116   :  { %vm608_vm5 = vcmp.lt.s32.totalorder %v580_v18, 64 }
 0x117   :  { %v543_v53 = vmul.f32 %v1339_v37, %v1339_v37  ;;  %v522_v56 = vadd.f32 %v521_v52, %v1339_v37 }
 0x118   :  { %v419_v38 = vpop.f32.mrf.mxu0 }
 0x119   :  { %v420_v40 = vadd.f32 %v419_v38, %v378_v33  ;;  %v460_v41 = vpop.f32.mrf.mxu1  ;;  %v564_v62 = vadd.f32 %v563_v55, %v543_v53 }
 0x11b   :  { %v461_v48 = vadd.f32 %v460_v41, %v420_v40 }
 0x11c   :  { %v501_v54 = vpop.f32.mrf.mxu2 }
 0x11d   :  { %v1348_v58 = vadd.f32 %v501_v54, %v461_v48 }
 0x11f   :  { %v523_v63 = vadd.f32 %v522_v56, %v1348_v58  ;;  %v545_v1 = vmul.f32 %v1348_v58, %v1348_v58 }
 0x121   :  { %v524_v2 = vrot.slane %v523_v63, 4  ;;  %v565_v4 = vadd.f32 %v564_v62, %v545_v1 }
 0x123   :  { %v525_v6 = vadd.f32 %v524_v2, %v523_v63  ;;  %v566_v7 = vrot.slane %v565_v4, 4 }
 0x125   :  { %v526_v9 = vrot.slane %v525_v6, 2  ;;  %v567_v11 = vadd.f32 %v566_v7, %v565_v4 }
 0x127   :  { %v527_v15 = vadd.f32 %v526_v9, %v525_v6  ;;  %v568_v30 = vrot.slane %v567_v11, 2 }
 0x129   :  { %v528_v46 = vrot.slane %v527_v15, 1  ;;  %v569_v57 = vadd.f32 %v568_v30, %v567_v11 }
 0x12b   :  { %v570_v60 = vrot.slane %v569_v57, 1  ;;  %v529_v0 = vadd.f32 %v528_v46, %v527_v15  ;;  %v621_v15 = vld [vmem:[%s1429_s2] sm:$0x3] }
 0x12d   :  { %v571_v8 = vadd.f32 %v570_v60, %v569_v57 }
 0x12f   :  { %v574_v14 = vsel %vm572_vm1, %v529_v0, %v571_v8  ;;  %v640_v8 = vld [vmem:[%s1430_s3] sm:$0x3] }
 0x130   :  { %577 = vrot.lane.b32.xlu0 %v574_v14, %s749_s0 }
 0x164   :  { %v576_v17 = vpop.permute.xlu0 %575 }
 0x1a2   :  { %v578_v20 = vpop.permute.xlu0 %577 }
 0x1a3   :  { %v583_v21 = vsel %vm581_vm2, %v578_v20, %v576_v17  ;;  %v582_v23 = vsel %vm581_vm2, %v576_v17, %v578_v20 }
 0x1a4   :  { %v584_v22 = vadd.f32 %v583_v21, %v1309_v49  ;;  %v585_v24 = vadd.f32 %v582_v23, %v574_v14 }
 0x1a6   :  { %586 = vrot.lane.b32.xlu1 %v584_v22, %s750_s22 }
 0x1ae   :  { %588 = vrot.lane.b32.xlu1 %v585_v24, %s750_s22 }
 0x218   :  { %v587_v26 = vpop.permute.xlu1 %586 }
 0x220   :  { %v589_v27 = vpop.permute.xlu1 %588 }
 0x221   :  { %v592_v28 = vsel %vm590_vm3, %v589_v27, %v587_v26  ;;  %v591_v31 = vsel %vm590_vm3, %v587_v26, %v589_v27 }
 0x222   :  { %v593_v29 = vadd.f32 %v592_v28, %v584_v22  ;;  %v594_v33 = vadd.f32 %v591_v31, %v585_v24 }
 0x224   :  { %595 = vrot.lane.b32.xlu2 %v593_v29, %s751_s23 }
 0x22c   :  { %597 = vrot.lane.b32.xlu2 %v594_v33, %s751_s23 }
 0x27e   :  { %v596_v34 = vpop.permute.xlu2 %595 }
 0x286   :  { %v598_v35 = vpop.permute.xlu2 %597 }
 0x287   :  { %v600_v36 = vsel %vm599_vm4, %v596_v34, %v598_v35  ;;  %v601_v49 = vsel %vm599_vm4, %v598_v35, %v596_v34 }
 0x288   :  { %v602_v38 = vadd.f32 %v601_v49, %v593_v29  ;;  %v603_v40 = vadd.f32 %v600_v36, %v594_v33 }
 0x28a   :  { %604 = vrot.lane.b32.xlu0 %v602_v38, %s752_s24  ;;  %606 = vrot.lane.b32.xlu1 %v603_v40, %s752_s24 }
 0x2fc   :  { %v605_v41 = vpop.permute.xlu0 %604  ;;  %v607_v42 = vpop.permute.xlu1 %606 }
 0x2fd   :  { %v609_v43 = vsel %vm608_vm5, %v605_v41, %v607_v42  ;;  %v610_v45 = vsel %vm608_vm5, %v607_v42, %v605_v41 }
 0x2fe   :  { %v611_v48 = vadd.f32 %v610_v45, %v602_v38  ;;  %v612_v50 = vadd.f32 %v609_v43, %v603_v40 }
 0x300   :  { %v613_v52 = vadd.f32 %v612_v50, %v611_v48 }
 0x302   :  { %v614_v53 = vmul.f32 0.00048828125, %v613_v52 }
 0x304   :  { %v615_v54 = vmul.f32 %v614_v53, %v614_v53 }
 0x306   :  { %v617_v55 = vrot.slane %v615_v54, 7 }
 0x308   :  { %v619_v56 = vsub.f32 %v614_v53, %v617_v55 }
 0x30a   :  { %v620_v62 = vmax.f32 %v619_v56, 0.0 }
 0x30c   :  { %v622_v63 = vadd.f32 1e-05, %v620_v62 }
 0x30e   :  { %747 = vrsqrt.f32 %v622_v63  ;;  %vm629_vm7 = vweird.f32 %v622_v63 }
 0x314   :  { %v748_v1 = vpop.eup %747 }
 0x315   :  { %v624_v2 = vmul.f32 %v748_v1, %v622_v63  ;;  %vm630_vm6 = vweird.f32 %v748_v1 }
 0x316   :  { %vm631_vm8 = vmor %vm629_vm7, %vm630_vm6 }
 0x317   :  { %v625_v4 = vmul.f32 %v748_v1, %v624_v2 }
 0x319   :  { %v626_v6 = vmul.f32 0.5, %v625_v4 }
 0x31b   :  { %v627_v7 = vsub.f32 1.5, %v626_v6 }
 0x31d   :  { %v628_v9 = vmul.f32 %v748_v1, %v627_v7 }
 0x31f   :  { %v632_v11 = vsel %vm631_vm8, %v748_v1, %v628_v9 }
 0x320   :  { %634 = vst [vmem:[#allocation1] sm:$0xff] %v632_v11 }
 0x321   :  { %635 = vst [vmem:[#allocation1 + $0x9] sm:$0xff] %v632_v11 }
 0x328   :  { %v637_v30 = vld [vmem:[#allocation1 + $0x1] ss:$9 sm:$0xff] }
 0x329   :  { %v639_v46 = vmul.f32 %v637_v30, %v621_v15 }
 0x32b   :  { %v642_v57 = vperm.slane %v639_v46, 0  ;;  %v643_v60 = vperm.slane %v639_v46, 1 }
 0x32d   :  { %v647_v0 = vmul.f32 %v643_v60, %v614_v53  ;;  %v646_v14 = vmul.f32 %v642_v57, %v614_v53  ;;  %v654_v20 = vmul.f32 %v642_v57, %v1270_v44  ;;  %v655_v21 = vmul.f32 %v643_v60, %v1315_v10 }
 0x32e   :  { %v656_v22 = vmul.f32 %v642_v57, %v1268_v39  ;;  %v657_v26 = vmul.f32 %v643_v60, %v1313_v61  ;;  %v658_v27 = vmul.f32 %v642_v57, %v1272_v47  ;;  %v659_v33 = vmul.f32 %v643_v60, %v1317_v12 }
 0x32f   :  { %v650_v5 = vrot.slane %v647_v0, 7  ;;  %v660_v35 = vmul.f32 %v642_v57, %v1276_v51  ;;  %v661_v44 = vmul.f32 %v643_v60, %v1321_v19  ;;  %v662_v10 = vmul.f32 %v642_v57, %v1284_v59 }
 0x330   :  { %v663_v47 = vmul.f32 %v643_v60, %v1329_v25  ;;  %v664_v43 = vmul.f32 %v642_v57, %v1289_v3  ;;  %v665_v51 = vmul.f32 %v643_v60, %v1334_v32  ;;  %v666_v25 = vmul.f32 %v642_v57, %v1294_v13 }
 0x331   :  { %v651_v17 = vsel %vm572_vm1, %v646_v14, %v650_v5  ;;  %v667_v3 = vmul.f32 %v643_v60, %v1339_v37  ;;  %v668_v32 = vmul.f32 %v642_v57, %v1303_v16  ;;  %v669_v13 = vmul.f32 %v643_v60, %v1348_v58 }
 0x332   :  { %v653_v18 = vsub.f32 %v640_v8, %v651_v17 }
 0x334   :  { %v671_v23 = vperm.slane %v653_v18, 0  ;;  %v672_v24 = vperm.slane %v653_v18, 1 }
 0x336   :  { %v675_v28 = vadd.f32 %v671_v23, %v654_v20  ;;  %v676_v29 = vadd.f32 %v672_v24, %v655_v21  ;;  %v677_v31 = vadd.f32 %v671_v23, %v656_v22  ;;  %v678_v34 = vadd.f32 %v672_v24, %v657_v26 }
 0x337   :  { %v679_v36 = vadd.f32 %v671_v23, %v658_v27  ;;  %v680_v39 = vadd.f32 %v672_v24, %v659_v33  ;;  %v681_v49 = vadd.f32 %v671_v23, %v660_v35  ;;  %v682_v41 = vadd.f32 %v672_v24, %v661_v44 }
 0x338   :  { %v691_v38 = vmax.f32 %v675_v28, 0.0  ;;  %v692_v40 = vmax.f32 %v676_v29, 0.0  ;;  %v693_v61 = vmax.f32 %v677_v31, 0.0  ;;  %v694_v42 = vmax.f32 %v678_v34, 0.0 }
 0x339   :  { %v683_v12 = vadd.f32 %v671_v23, %v662_v10  ;;  %v695_v45 = vmax.f32 %v679_v36, 0.0  ;;  %v684_v59 = vadd.f32 %v672_v24, %v663_v47  ;;  %v696_v19 = vmax.f32 %v680_v39, 0.0 }
 0x33a   :  { %707 = vst [vmem:[%s1431_s4] sm:$0xff] %v691_v38  ;;  %v685_v48 = vadd.f32 %v671_v23, %v664_v43  ;;  %v697_v50 = vmax.f32 %v681_v49, 0.0  ;;  %v686_v52 = vadd.f32 %v672_v24, %v665_v51  ;;  %v698_v53 = vmax.f32 %v682_v41, 0.0 }
 0x33b   :  { %708 = vst [vmem:[%s1431_s4 + $0x8] sm:$0xff] %v692_v40  ;;  %v687_v54 = vadd.f32 %v671_v23, %v666_v25  ;;  %v699_v55 = vmax.f32 %v683_v12, 0.0  ;;  %v688_v56 = vadd.f32 %v672_v24, %v667_v3  ;;  %v700_v62 = vmax.f32 %v684_v59, 0.0 }
 0x33c   :  { %709 = vst [vmem:[%s1431_s4 + $0x10] sm:$0xff] %v693_v61  ;;  %v689_v37 = vadd.f32 %v671_v23, %v668_v32  ;;  %v701_v63 = vmax.f32 %v685_v48, 0.0  ;;  %v690_v16 = vadd.f32 %v672_v24, %v669_v13  ;;  %v702_v1 = vmax.f32 %v686_v52, 0.0 }
 0x33d   :  { %710 = vst [vmem:[%s1431_s4 + $0x18] sm:$0xff] %v694_v42  ;;  %v703_v2 = vmax.f32 %v687_v54, 0.0  ;;  %v704_v58 = vmax.f32 %v688_v56, 0.0 }
 0x33e   :  { %711 = vst [vmem:[%s1431_s4 + $0x20] sm:$0xff] %v695_v45  ;;  %v705_v4 = vmax.f32 %v689_v37, 0.0  ;;  %v706_v6 = vmax.f32 %v690_v16, 0.0 }
 0x33f   :  { %712 = vst [vmem:[%s1431_s4 + $0x28] sm:$0xff] %v696_v19 }
 0x340   :  { %713 = vst [vmem:[%s1431_s4 + $0x30] sm:$0xff] %v697_v50 }
 0x341   :  { %714 = vst [vmem:[%s1431_s4 + $0x38] sm:$0xff] %v698_v53 }
 0x342   :  { %715 = vst [vmem:[%s1431_s4 + $0x40] sm:$0xff] %v699_v55 }
 0x343   :  { %716 = vst [vmem:[%s1431_s4 + $0x48] sm:$0xff] %v700_v62 }
 0x344   :  { %717 = vst [vmem:[%s1431_s4 + $0x50] sm:$0xff] %v701_v63 }
 0x345   :  { %718 = vst [vmem:[%s1431_s4 + $0x58] sm:$0xff] %v702_v1 }
 0x346   :  { %719 = vst [vmem:[%s1431_s4 + $0x60] sm:$0xff] %v703_v2 }
 0x347   :  { %720 = vst [vmem:[%s1431_s4 + $0x68] sm:$0xff] %v704_v58 }
 0x348   :  { %721 = vst [vmem:[%s1431_s4 + $0x70] sm:$0xff] %v705_v4 }
 0x349   :  { %722 = vst [vmem:[%s1431_s4 + $0x78] sm:$0xff] %v706_v6 }

</bundles_post_ra>
